<compile_context>
chip_gen: v5e
topology: v5e:2x2
jax: 0.10.0
libtpu: 0.0.40
codegen_flags: <defaults>
</compile_context>

<pallas_src>
import functools

import jax
import jax.numpy as jnp
from jax.experimental import pallas as pl
from jax.experimental.pallas import tpu as pltpu

_LANE_COLS = 512        # lane-dense last dim (multiple of 128)
_MAX_BLOCK_ROWS = 1024  # 1024 x 512 f32 = 2 MiB per block


def _dropout_kernel(seed_ref, x_ref, o_ref, *, threshold, scale):
    """Dropout on one (block_rows, cols) tile using a counter-based hash PRNG."""
    rows, cols = x_ref.shape
    i = pl.program_id(0)

    # Global linear element index for this tile (used purely as a PRNG counter).
    row_ids = jax.lax.broadcasted_iota(jnp.int32, (rows, cols), 0)
    col_ids = jax.lax.broadcasted_iota(jnp.int32, (rows, cols), 1)
    idx = (i * rows + row_ids) * cols + col_ids
    u = idx.astype(jnp.uint32)

    # Mix in the (prefetched) seed, then a lowbias32-style avalanche finalizer.
    seed_u = (seed_ref[0].astype(jnp.uint32) * jnp.uint32(0x9E3779B9)
              + jnp.uint32(0x85EBCA6B))
    h = u ^ seed_u
    h = h ^ (h >> 16)
    h = h * jnp.uint32(0x7FEB352D)
    h = h ^ (h >> 15)
    h = h * jnp.uint32(0x846CA68B)
    h = h ^ (h >> 16)

    # Integer threshold: keep with probability (2^32 - threshold) / 2^32 = 1 - p.
    keep = h >= jnp.uint32(threshold)

    x = x_ref[...]
    scale_c = jnp.asarray(scale, dtype=x.dtype)          # stay in x's dtype (bf16-friendly)
    o_ref[...] = jnp.where(keep, x * scale_c, jnp.zeros_like(x))


def no_positional_encoding_forward(x, *, p=0.1, training=True, seed=0):
    """Pallas TPU implementation of NoPositionalEncoding.forward (i.e. dropout)."""
    if (not training) or p == 0.0:
        return x                      # identity: skip the HBM round-trip entirely
    if p >= 1.0:
        return jnp.zeros_like(x)

    orig_shape = x.shape
    n = x.size
    cols = _LANE_COLS

    # Lane-dense 2D layout.  If the flat size already tiles cleanly this is a pure
    # (free) reshape; otherwise pad the tail (< 8*cols extra elements).
    if n % cols == 0 and (n // cols) % 8 == 0:
        rows = n // cols
        pad = 0
    else:
        rows = -(-n // cols)
        rows = -(-rows // 8) * 8      # sublane-aligned
        pad = rows * cols - n

    block_rows = min(_MAX_BLOCK_ROWS, rows)   # rows is a multiple of 8, so block is too

    x_flat = x.reshape(-1)
    if pad:
        x_flat = jnp.pad(x_flat, (0, pad))
    x2d = x_flat.reshape(rows, cols)

    seed_arr = jnp.asarray([seed], dtype=jnp.int32)
    threshold = min(int(round(float(p) * 2.0 ** 32)), 2 ** 32 - 1)
    scale = 1.0 / (1.0 - float(p))
    kernel = functools.partial(_dropout_kernel, threshold=threshold, scale=scale)

    nbytes = rows * cols * x.dtype.itemsize
    out2d = pl.pallas_call(
        kernel,
        out_shape=jax.ShapeDtypeStruct((rows, cols), x.dtype),
        grid_spec=pltpu.PrefetchScalarGridSpec(
            num_scalar_prefetch=1,
            grid=(pl.cdiv(rows, block_rows),),
            in_specs=[pl.BlockSpec((block_rows, cols), lambda i, seed: (i, 0))],
            out_specs=pl.BlockSpec((block_rows, cols), lambda i, seed: (i, 0)),
        ),
        compiler_params=pltpu.CompilerParams(
            dimension_semantics=("parallel",),          # shard across TCs on v7x
            vmem_limit_bytes=32 * 1024 * 1024,          # safe on v5e/v6e/v7x
        ),
        cost_estimate=pl.CostEstimate(
            flops=2 * rows * cols, transcendentals=0, bytes_accessed=2 * nbytes),
    )(seed_arr, x2d)

    if pad:
        return out2d.reshape(-1)[:n].reshape(orig_shape)
    return out2d.reshape(orig_shape)


# `index` and `get` of the PyTorch module both return None — no kernel needed.
def no_positional_encoding_index(inds):
    return None


def no_positional_encoding_get(size):
    return None


if __name__ == "__main__":
    batch, seq, d_model = 2, 8, 32
    key = jax.random.PRNGKey(0)
    x = jax.random.normal(key, (batch, seq, d_model), dtype=jnp.float32)

    # Eval mode: dropout is the identity (short-circuited, no kernel launch).
    y_eval = jax.block_until_ready(
        no_positional_encoding_forward(x, p=0.1, training=False))
    assert y_eval.shape == x.shape and y_eval.dtype == x.dtype
    assert bool(jnp.array_equal(y_eval, x)), "eval-mode dropout must be identity"

    # Train mode: every output element is either 0 (dropped) or x/(1-p) (kept).
    p = 0.1
    y = jax.block_until_ready(
        no_positional_encoding_forward(x, p=p, training=True, seed=1234))
    assert y.shape == x.shape and y.dtype == x.dtype
    scaled = x / (1.0 - p)
    is_kept = jnp.isclose(y, scaled, rtol=1e-5, atol=1e-6)
    is_dropped = (y == 0.0)
    assert bool(jnp.all(is_kept | is_dropped)), "output must be 0 or x/(1-p)"
    drop_frac = float(jnp.mean(jnp.logical_and(is_dropped, ~is_kept)))
    assert 0.0 < drop_frac < 0.5, f"implausible drop fraction {drop_frac}"

    # Deterministic for a fixed seed.
    y2 = jax.block_until_ready(
        no_positional_encoding_forward(x, p=p, training=True, seed=1234))
    assert bool(jnp.array_equal(y, y2))

    # bf16 input + cleanly-tiling (unpadded) lane-dense path.
    xb = jax.random.normal(jax.random.PRNGKey(1), (4, 16, 128), dtype=jnp.bfloat16)
    yb = jax.block_until_ready(
        no_positional_encoding_forward(xb, p=0.25, training=True, seed=7))
    assert yb.shape == xb.shape and yb.dtype == xb.dtype

    print("KERNEL_OK")
</pallas_src>

<mosaic_0001>
module attributes {stable_mosaic.version = 11 : i64} {
  func.func @_dropout_kernel(%arg0: i32, %arg1: memref<1xi32, #tpu.memory_space<smem>>, %arg2: memref<8x512xf32, #tpu.memory_space<vmem>>, %arg3: memref<8x512xf32, #tpu.memory_space<vmem>>) attributes {dimension_semantics = [#tpu.dimension_semantics<parallel>], iteration_bounds = array<i64: 1>, scalar_prefetch = 1 : i64, scratch_operands = 0 : i64, tpu.core_type = #tpu.core_type<tc>, window_params = [{transform_indices = @transform_0, window_bounds = array<i64: 8, 512>}, {transform_indices = @transform_1, window_bounds = array<i64: 8, 512>}]} {
    %0 = tpu.iota {dimensions = array<i32: 0>} : vector<8x512xi32>
    %1 = tpu.iota {dimensions = array<i32: 1>} : vector<8x512xi32>
    %c8_i32 = arith.constant 8 : i32
    %2 = arith.muli %arg0, %c8_i32 : i32
    %3 = vector.broadcast %2 : i32 to vector<8x512xi32>
    %4 = arith.addi %3, %0 : vector<8x512xi32>
    %c512_i32 = arith.constant 512 : i32
    %5 = vector.broadcast %c512_i32 : i32 to vector<8x512xi32>
    %6 = arith.muli %4, %5 : vector<8x512xi32>
    %7 = arith.addi %6, %1 : vector<8x512xi32>
    %c0 = arith.constant 0 : index
    %8 = memref.load %arg1[%c0] : memref<1xi32, #tpu.memory_space<smem>>
    %c-1640531527_i32 = arith.constant -1640531527 : i32
    %9 = arith.muli %8, %c-1640531527_i32 : i32
    %c-2048144789_i32 = arith.constant -2048144789 : i32
    %10 = arith.addi %9, %c-2048144789_i32 : i32
    %11 = vector.broadcast %10 : i32 to vector<8x512xi32>
    %12 = arith.xori %7, %11 : vector<8x512xi32>
    %c16_i32 = arith.constant 16 : i32
    %13 = vector.broadcast %c16_i32 : i32 to vector<8x512xi32>
    %14 = arith.shrui %12, %13 : vector<8x512xi32>
    %15 = arith.xori %12, %14 : vector<8x512xi32>
    %c2146121005_i32 = arith.constant 2146121005 : i32
    %16 = vector.broadcast %c2146121005_i32 : i32 to vector<8x512xi32>
    %17 = arith.muli %15, %16 : vector<8x512xi32>
    %c15_i32 = arith.constant 15 : i32
    %18 = vector.broadcast %c15_i32 : i32 to vector<8x512xi32>
    %19 = arith.shrui %17, %18 : vector<8x512xi32>
    %20 = arith.xori %17, %19 : vector<8x512xi32>
    %c-2073254261_i32 = arith.constant -2073254261 : i32
    %21 = vector.broadcast %c-2073254261_i32 : i32 to vector<8x512xi32>
    %22 = arith.muli %20, %21 : vector<8x512xi32>
    %c16_i32_0 = arith.constant 16 : i32
    %23 = vector.broadcast %c16_i32_0 : i32 to vector<8x512xi32>
    %24 = arith.shrui %22, %23 : vector<8x512xi32>
    %25 = arith.xori %22, %24 : vector<8x512xi32>
    %c429496730_i32 = arith.constant 429496730 : i32
    %26 = vector.broadcast %c429496730_i32 : i32 to vector<8x512xi32>
    %27 = arith.cmpi uge, %25, %26 : vector<8x512xi32>
    %c0_1 = arith.constant 0 : index
    %c0_2 = arith.constant 0 : index
    %28 = vector.load %arg2[%c0_1, %c0_2] : memref<8x512xf32, #tpu.memory_space<vmem>>, vector<8x512xf32>
    %cst = arith.constant 1.11111116 : f32
    %29 = vector.broadcast %cst : f32 to vector<8x512xf32>
    %30 = arith.mulf %28, %29 : vector<8x512xf32>
    %cst_3 = arith.constant 0.000000e+00 : f32
    %31 = vector.broadcast %cst_3 : f32 to vector<8x512xf32>
    %32 = arith.select %27, %30, %31 : vector<8x512xi1>, vector<8x512xf32>
    %c0_4 = arith.constant 0 : index
    %c0_5 = arith.constant 0 : index
    %33 = vector.load %arg3[%c0_4, %c0_5] : memref<8x512xf32, #tpu.memory_space<vmem>>, vector<8x512xf32>
    tpu.vector_store %arg3[%c0_4, %c0_5], %32 {strides = array<i32>} : memref<8x512xf32, #tpu.memory_space<vmem>>, vector<8x512xf32>,
    return
  }
  func.func @transform_0(%arg0: i32, %arg1: memref<1xi32, #tpu.memory_space<smem>>) -> (i32, i32) {
    %c0_i32 = arith.constant 0 : i32
    %c0_i32_0 = arith.constant 0 : i32
    return %arg0, %c0_i32 : i32, i32
  }
  func.func @transform_1(%arg0: i32, %arg1: memref<1xi32, #tpu.memory_space<smem>>) -> (i32, i32) {
    %c0_i32 = arith.constant 0 : i32
    %c0_i32_0 = arith.constant 0 : i32
    return %arg0, %c0_i32 : i32, i32
  }
}

</mosaic_0001>

<bundles_post_ra>
// kernel: tpu_custom_call.1
= control target key start
LH: loop header
LB: loop body
LE: loop exit
PB: predicated region body
PF: predicated region fallthrough
CT: control target
= control target key end

     0   :  { %8 = vsyncpa [#allocation5], 0  ;;  %s209_s0 = inlined_call_operand.<no memory space> [shape: s32[1], index: 0, kind: input, shape index: {}]   ;;  %s210_s1 = inlined_call_operand.hbm [shape: f32[8,512], index: 1, kind: input, shape index: {}]   ;;  %s211_s2 = inlined_call_operand.hbm [shape: f32[8,512], index: 2, kind: output, shape index: {}]  }
   0x1   :  { %9 = vsyncpa [#allocation6], 0  ;;  %s15_s11 = sshll.u32 %s210_s1, 4  ;;  %s183_s12 = smov [#allocation4]   ;;  %s16_s11 = int_to_ptr.hbm [resolvable:$true] %s15_s11 }
   0x2   :  { %s17_s13 = sshll.u32 %s183_s12, 4  ;;  %s18_s13 = int_to_ptr.vmem [resolvable:$true] %s17_s13 }
   0x3   :  { %20 = dma.hbm_to_vmem [thread:$0]  %s16_s11, 512, %s18_s13, [#allocation5]  }
   0x4   :  { %179 = dma.done.wait [#allocation5], 512  }
   0x5   :  { %180 = vsyncadd [#allocation5], 4294966784  ;;  %v25_v0 = vlaneseq  ;;  %s41_s16 = smul.u32 2654435769, %s209_s0  ;;  %v92_v41 = vld [vmem:[#allocation4] sm:$0xff]  ;;  %v93_v43 = vld [vmem:[#allocation4 + $0x8] sm:$0xff] }
   0x6   :  { %v94_v45 = vld [vmem:[#allocation4 + $0x10] sm:$0xff]  ;;  %v95_v47 = vld [vmem:[#allocation4 + $0x18] sm:$0xff]  ;;  %v96_v50 = vmul.f32 1.1111112, %v92_v41  ;;  %v97_v51 = vmul.f32 1.1111112, %v93_v43 }
   0x7   :  { %v26_v1 = vshrl.u32 %v25_v0, 7  ;;  %v28_v2 = vand.u32 127, %v25_v0  ;;  %s42_s17 = sadd.s32 2246822507, %s41_s16  ;;  %v98_v56 = vmul.f32 1.1111112, %v94_v45 }
   0x8   :  { %v43_v7 = vstv %s42_s17  ;;  %v99_v57 = vmul.f32 1.1111112, %v95_v47  ;;  %s184_s0 = smov [#allocation7]   ;;  %s115_s20 = sshll.u32 %s211_s2, 4  ;;  %s116_s20 = int_to_ptr.hbm [resolvable:$true] %s115_s20 }
   0x9   :  { %v35_v3 = vmul.u32 512, %v26_v1  ;;  %v29_v4 = vadd.s32 128, %v28_v2  ;;  %v30_v5 = vadd.s32 256, %v28_v2  ;;  %v31_v6 = vadd.s32 384, %v28_v2  ;;  %s113_s1 = sshll.u32 %s184_s0, 4  ;;  %s114_s1 = int_to_ptr.vmem [resolvable:$true] %s113_s1 }
   0xb   :  { %v36_v8 = vadd.s32 %v35_v3, %v28_v2  ;;  %v37_v9 = vadd.s32 %v35_v3, %v29_v4  ;;  %v38_v10 = vadd.s32 %v35_v3, %v30_v5  ;;  %v39_v11 = vadd.s32 %v35_v3, %v31_v6 }
   0xd   :  { %v44_v12 = vxor.u32 %v43_v7, %v36_v8  ;;  %v45_v13 = vxor.u32 %v43_v7, %v37_v9  ;;  %v46_v14 = vxor.u32 %v43_v7, %v38_v10  ;;  %v47_v15 = vxor.u32 %v43_v7, %v39_v11 }
   0xf   :  { %v48_v16 = vshrl.u32 %v44_v12, 16  ;;  %v49_v17 = vshrl.u32 %v45_v13, 16  ;;  %v50_v18 = vshrl.u32 %v46_v14, 16  ;;  %v51_v19 = vshrl.u32 %v47_v15, 16 }
  0x11   :  { %v52_v20 = vxor.u32 %v48_v16, %v44_v12  ;;  %v53_v21 = vxor.u32 %v49_v17, %v45_v13  ;;  %v54_v22 = vxor.u32 %v50_v18, %v46_v14  ;;  %v55_v23 = vxor.u32 %v51_v19, %v47_v15 }
  0x13   :  { %v56_v24 = vmul.u32 2146121005, %v52_v20  ;;  %v57_v25 = vmul.u32 2146121005, %v53_v21  ;;  %v58_v26 = vmul.u32 2146121005, %v54_v22 }
  0x14   :  { %v59_v27 = vmul.u32 2146121005, %v55_v23 }
  0x15   :  { %v60_v28 = vshrl.u32 %v56_v24, 15  ;;  %v61_v29 = vshrl.u32 %v57_v25, 15  ;;  %v62_v30 = vshrl.u32 %v58_v26, 15 }
  0x16   :  { %v63_v31 = vshrl.u32 %v59_v27, 15 }
  0x17   :  { %v64_v32 = vxor.u32 %v60_v28, %v56_v24  ;;  %v65_v33 = vxor.u32 %v61_v29, %v57_v25  ;;  %v66_v34 = vxor.u32 %v62_v30, %v58_v26 }
  0x18   :  { %v67_v35 = vxor.u32 %v63_v31, %v59_v27 }
  0x19   :  { %v68_v36 = vmul.u32 2221713035, %v64_v32  ;;  %v69_v37 = vmul.u32 2221713035, %v65_v33  ;;  %v70_v38 = vmul.u32 2221713035, %v66_v34 }
  0x1a   :  { %v71_v39 = vmul.u32 2221713035, %v67_v35 }
  0x1b   :  { %v72_v40 = vshrl.u32 %v68_v36, 16  ;;  %v73_v42 = vshrl.u32 %v69_v37, 16  ;;  %v74_v44 = vshrl.u32 %v70_v38, 16 }
  0x1c   :  { %v75_v46 = vshrl.u32 %v71_v39, 16 }
  0x1d   :  { %v76_v48 = vxor.u32 %v72_v40, %v68_v36  ;;  %v77_v49 = vxor.u32 %v73_v42, %v69_v37  ;;  %v78_v52 = vxor.u32 %v74_v44, %v70_v38 }
  0x1e   :  { %v79_v53 = vxor.u32 %v75_v46, %v71_v39 }
  0x1f   :  { %v125_v54 = vxor.u32 2147483648, %v76_v48  ;;  %v126_v55 = vxor.u32 2147483648, %v77_v49  ;;  %v127_v58 = vxor.u32 2147483648, %v78_v52 }
  0x20   :  { %v128_v59 = vxor.u32 2147483648, %v79_v53 }
  0x21   :  { %vm82_vm0 = vcmp.ge.s32.totalorder %v125_v54, 2576980378  ;;  %vm85_vm1 = vcmp.ge.s32.totalorder %v126_v55, 2576980378  ;;  %vm88_vm2 = vcmp.ge.s32.totalorder %v127_v58, 2576980378 }
  0x22   :  { %v100_v60 = vsel %vm82_vm0, %v96_v50, 0.0  ;;  %v101_v61 = vsel %vm85_vm1, %v97_v51, 0.0  ;;  %vm91_vm3 = vcmp.ge.s32.totalorder %v128_v59, 2576980378  ;;  %v102_v62 = vsel %vm88_vm2, %v98_v56, 0.0 }
  0x23   :  { %104 = vst [vmem:[#allocation7] sm:$0xff] %v100_v60  ;;  %v103_v63 = vsel %vm91_vm3, %v99_v57, 0.0 }
  0x24   :  { %105 = vst [vmem:[#allocation7 + $0x8] sm:$0xff] %v101_v61 }
  0x25   :  { %106 = vst [vmem:[#allocation7 + $0x10] sm:$0xff] %v102_v62 }
  0x26   :  { %107 = vst [vmem:[#allocation7 + $0x18] sm:$0xff] %v103_v63 }
  0x27   :  { %118 = dma.vmem_to_hbm [thread:$0]  %s114_s1, 512, %s116_s20, [#allocation6]  }
  0x28   :  { %181 = dma.done.wait [#allocation6], 512  }
  0x29   :  { %182 = vsyncadd [#allocation6], 4294966784 }
  0x2a   :  { %123 = vsyncpa [#allocation5], 1 }
  0x2b   :  { %124 = vsyncpa [#allocation6], 1 }

</bundles_post_ra>
